<compile_context>
chip_gen: v7x
topology: tpu7x:2x2x1
jax: 0.10.0
libtpu: 0.0.40
codegen_flags: <defaults>
</compile_context>

<pallas_src>
import jax
import jax.numpy as jnp
from jax.experimental import pallas as pl
from jax.experimental.pallas import tpu as pltpu


def _round_up(x, m):
    return ((x + m - 1) // m) * m


def _linear_kernel(x_ref, wt_ref, b_ref, o_ref, acc_ref):
    # grid = (N tiles [parallel], K tiles [arbitrary/reduction])
    k = pl.program_id(1)

    @pl.when(k == 0)
    def _():
        acc_ref[...] = jnp.zeros_like(acc_ref)

    # x_ref: (tm, tk), wt_ref: (tk, n_out_p)  ->  contract on dim directly,
    # no transpose / relayout before the MXU push.
    acc_ref[...] += jnp.dot(
        x_ref[...], wt_ref[...], preferred_element_type=jnp.float32
    )

    @pl.when(k == pl.num_programs(1) - 1)
    def _():
        o_ref[...] = (
            acc_ref[...] + b_ref[...].astype(jnp.float32)
        ).astype(o_ref.dtype)


def classifier_forward(x, w, b, *, tm=None, tk=None, vmem_limit_bytes=64 << 20):
    """y = x @ w.T + b   (exact semantics of nn.Linear.forward).

    x: (N, dim), w: (n_way, dim), b: (n_way,)  ->  (N, n_way)
    """
    n, dim = x.shape
    n_way, dim_w = w.shape
    assert dim_w == dim, "weight/input dim mismatch"
    dtype = x.dtype

    # --- padded / tiled geometry -------------------------------------------
    # Lane-dense output: pad n_way to a multiple of 128.
    n_out_p = _round_up(n_way, 128)
    # Pad dim to a multiple of 128 so the K axis tiles cleanly.
    dim_p = _round_up(dim, 128)

    # Row tile: multiple of the sublane count (8 f32 / 16 bf16).
    sub = 16 if dtype == jnp.bfloat16 else 8
    if tm is None:
        tm = 512 if dtype == jnp.bfloat16 else 256  # sized for 64 MiB v7x VMEM
    n_p = _round_up(n, sub)
    tm = min(tm, n_p)
    n_p = _round_up(n_p, tm)

    # K tile (contraction over dim).
    if tk is None:
        tk = min(dim_p, 512)
    dim_p = _round_up(dim_p, tk)

    # --- zero-pad operands (zeros do not change x @ W.T + b) ---------------
    x_p = jnp.zeros((n_p, dim_p), dtype).at[:n, :dim].set(x)
    wt_p = jnp.zeros((dim_p, n_out_p), dtype).at[:dim, :n_way].set(w.T)
    b_p = jnp.zeros((1, n_out_p), dtype).at[0, :n_way].set(b)

    grid = (n_p // tm, dim_p // tk)

    out = pl.pallas_call(
        _linear_kernel,
        out_shape=jax.ShapeDtypeStruct((n_p, n_out_p), dtype),
        grid_spec=pltpu.PrefetchScalarGridSpec(
            num_scalar_prefetch=0,
            grid=grid,
            in_specs=[
                # x: tiled over rows and K
                pl.BlockSpec((tm, tk), lambda i, k: (i, k)),
                # W^T: tiled over K, full output lanes, reused across row tiles
                pl.BlockSpec((tk, n_out_p), lambda i, k: (k, 0)),
                # bias: one small block, reused every step
                pl.BlockSpec((1, n_out_p), lambda i, k: (0, 0)),
            ],
            out_specs=pl.BlockSpec((tm, n_out_p), lambda i, k: (i, 0)),
            scratch_shapes=[pltpu.VMEM((tm, n_out_p), jnp.float32)],
        ),
        compiler_params=pltpu.CompilerParams(
            # N axis parallel (shards across v7x's 2 TCs; neutral on v5e/v6e),
            # K axis is a reduction -> arbitrary.
            dimension_semantics=("parallel", "arbitrary"),
            vmem_limit_bytes=vmem_limit_bytes,
        ),
    )(x_p, wt_p, b_p)

    return out[:n, :n_way]


def init_classifier_params(key, dim, n_way, dtype=jnp.float32):
    """Deterministic init matching torch.nn.Linear default:
    U(-1/sqrt(dim), 1/sqrt(dim)) for both weight and bias."""
    kw, kb = jax.random.split(key)
    bound = 1.0 / (dim ** 0.5)
    w = jax.random.uniform(kw, (n_way, dim), dtype, minval=-bound, maxval=bound)
    b = jax.random.uniform(kb, (n_way,), dtype, minval=-bound, maxval=bound)
    return w, b


if __name__ == "__main__":
    key = jax.random.PRNGKey(0)

    # --- small shape consistent with the module (one few-shot episode) -----
    N, DIM, N_WAY = 8, 32, 5
    kx, kp, kx2, kp2 = jax.random.split(key, 4)

    x = jax.random.normal(kx, (N, DIM), jnp.float32)
    w, b = init_classifier_params(kp, DIM, N_WAY)

    y = jax.block_until_ready(classifier_forward(x, w, b))
    y_ref = x @ w.T + b
    assert y.shape == (N, N_WAY)
    assert jnp.allclose(y, y_ref, atol=1e-5, rtol=1e-5), "mismatch (small)"

    # --- moderately larger shape to exercise the tiled / multi-block path --
    N2, DIM2, NWAY2 = 272, 384, 7
    x2 = jax.random.normal(kx2, (N2, DIM2), jnp.float32)
    w2, b2 = init_classifier_params(kp2, DIM2, NWAY2)

    y2 = jax.block_until_ready(classifier_forward(x2, w2, b2))
    y2_ref = x2 @ w2.T + b2
    assert y2.shape == (N2, NWAY2)
    assert jnp.allclose(y2, y2_ref, atol=1e-4, rtol=1e-4), "mismatch (tiled)"

    print("KERNEL_OK")
</pallas_src>

<mosaic_0001>
module attributes {stable_mosaic.version = 11 : i64} {
  func.func @_linear_kernel(%arg0: i32, %arg1: i32, %arg2: memref<8x128xf32, #tpu.memory_space<vmem>>, %arg3: memref<128x128xf32, #tpu.memory_space<vmem>>, %arg4: memref<1x128xf32, #tpu.memory_space<vmem>>, %arg5: memref<8x128xf32, #tpu.memory_space<vmem>>, %arg6: memref<8x128xf32, #tpu.memory_space<vmem>>) attributes {dimension_semantics = [#tpu.dimension_semantics<parallel>, #tpu.dimension_semantics<arbitrary>], iteration_bounds = array<i64: 1, 1>, scalar_prefetch = 0 : i64, scratch_operands = 1 : i64, tpu.core_type = #tpu.core_type<tc>, window_params = [{transform_indices = @transform_0, window_bounds = array<i64: 8, 128>}, {transform_indices = @transform_1, window_bounds = array<i64: 128, 128>}, {pipeline_mode = #tpu.pipeline_mode<synchronous>, transform_indices = @transform_2, window_bounds = array<i64: 1, 128>}, {transform_indices = @transform_3, window_bounds = array<i64: 8, 128>}]} {
    %c0_i32 = arith.constant 0 : i32
    %0 = arith.cmpi eq, %arg1, %c0_i32 : i32
    %1 = arith.extui %0 : i1 to i32
    %c0_i32_0 = arith.constant 0 : i32
    %2 = arith.cmpi ne, %1, %c0_i32_0 : i32
    scf.if %2 {
      %cst_10 = arith.constant 0.000000e+00 : f32
      %12 = vector.broadcast %cst_10 : f32 to vector<8x128xf32>
      %c0_11 = arith.constant 0 : index
      %c0_12 = arith.constant 0 : index
      %13 = vector.load %arg6[%c0_11, %c0_12] : memref<8x128xf32, #tpu.memory_space<vmem>>, vector<8x128xf32>
      tpu.vector_store %arg6[%c0_11, %c0_12], %12 {strides = array<i32>} : memref<8x128xf32, #tpu.memory_space<vmem>>, vector<8x128xf32>,
    } else {
    }
    %c0 = arith.constant 0 : index
    %c0_1 = arith.constant 0 : index
    %3 = vector.load %arg6[%c0, %c0_1] : memref<8x128xf32, #tpu.memory_space<vmem>>, vector<8x128xf32>
    %c0_2 = arith.constant 0 : index
    %c0_3 = arith.constant 0 : index
    %4 = vector.load %arg2[%c0_2, %c0_3] : memref<8x128xf32, #tpu.memory_space<vmem>>, vector<8x128xf32>
    %c0_4 = arith.constant 0 : index
    %c0_5 = arith.constant 0 : index
    %5 = vector.load %arg3[%c0_4, %c0_5] : memref<128x128xf32, #tpu.memory_space<vmem>>, vector<128x128xf32>
    %cst = arith.constant dense<0.000000e+00> : vector<8x128xf32>
    %6 = tpu.matmul %4, %5, %cst {dimension_numbers = #tpu.dot_dimension_numbers<[1], [0], [0], [1], [0, 0, 1, 1], [], []>} : vector<8x128xf32>, vector<128x128xf32>, vector<8x128xf32> -> vector<8x128xf32>
    %7 = arith.addf %3, %6 : vector<8x128xf32>
    %c0_6 = arith.constant 0 : index
    %c0_7 = arith.constant 0 : index
    %8 = vector.load %arg6[%c0_6, %c0_7] : memref<8x128xf32, #tpu.memory_space<vmem>>, vector<8x128xf32>
    tpu.vector_store %arg6[%c0_6, %c0_7], %7 {strides = array<i32>} : memref<8x128xf32, #tpu.memory_space<vmem>>, vector<8x128xf32>,
    %c0_i32_8 = arith.constant 0 : i32
    %9 = arith.cmpi eq, %arg1, %c0_i32_8 : i32
    %10 = arith.extui %9 : i1 to i32
    %c0_i32_9 = arith.constant 0 : i32
    %11 = arith.cmpi ne, %10, %c0_i32_9 : i32
    scf.if %11 {
      %c0_10 = arith.constant 0 : index
      %c0_11 = arith.constant 0 : index
      %12 = vector.load %arg6[%c0_10, %c0_11] : memref<8x128xf32, #tpu.memory_space<vmem>>, vector<8x128xf32>
      %c0_12 = arith.constant 0 : index
      %c0_13 = arith.constant 0 : index
      %13 = vector.load %arg4[%c0_12, %c0_13] : memref<1x128xf32, #tpu.memory_space<vmem>>, vector<1x128xf32>
      %14 = vector.broadcast %13 : vector<1x128xf32> to vector<8x128xf32>
      %15 = arith.addf %12, %14 : vector<8x128xf32>
      %c0_14 = arith.constant 0 : index
      %c0_15 = arith.constant 0 : index
      %16 = vector.load %arg5[%c0_14, %c0_15] : memref<8x128xf32, #tpu.memory_space<vmem>>, vector<8x128xf32>
      tpu.vector_store %arg5[%c0_14, %c0_15], %15 {strides = array<i32>} : memref<8x128xf32, #tpu.memory_space<vmem>>, vector<8x128xf32>,
    } else {
    }
    return
  }
  func.func @transform_0(%arg0: i32, %arg1: i32) -> (i32, i32) {
    %c0_i32 = arith.constant 0 : i32
    return %arg0, %arg1 : i32, i32
  }
  func.func @transform_1(%arg0: i32, %arg1: i32) -> (i32, i32) {
    %c0_i32 = arith.constant 0 : i32
    %c0_i32_0 = arith.constant 0 : i32
    return %arg1, %c0_i32 : i32, i32
  }
  func.func @transform_2(%arg0: i32, %arg1: i32) -> (i32, i32) {
    %c0_i32 = arith.constant 0 : i32
    %c0_i32_0 = arith.constant 0 : i32
    %c0_i32_1 = arith.constant 0 : i32
    return %c0_i32, %c0_i32_0 : i32, i32
  }
  func.func @transform_3(%arg0: i32, %arg1: i32) -> (i32, i32) {
    %c0_i32 = arith.constant 0 : i32
    %c0_i32_0 = arith.constant 0 : i32
    return %arg0, %c0_i32 : i32, i32
  }
}

</mosaic_0001>

<bundles_post_ra>
// kernel: tpu_custom_call.1
= control target key start
LH: loop header
LB: loop body
LE: loop exit
PB: predicated region body
PF: predicated region fallthrough
CT: control target
= control target key end

     0   :  { %8 = vsyncpa [#allocation4], 0  ;;  %s433_s0 = inlined_call_operand.hbm [shape: f32[8,128], index: 0, kind: input, shape index: {}]   ;;  %s434_s1 = inlined_call_operand.hbm [shape: f32[128,128], index: 1, kind: input, shape index: {}]   ;;  %s435_s2 = inlined_call_operand.hbm [shape: f32[1,128], index: 2, kind: input, shape index: {}]   ;;  %s436_s3 = inlined_call_operand.hbm [shape: f32[8,128], index: 3, kind: output, shape index: {}]  }
   0x1   :  { %9 = vsyncpa [#allocation7], 0 }
   0x2   :  { %10 = vsyncpa [#allocation5], 0  ;;  %s356_s12 = smov [#allocation6]   ;;  %s262_s16 = scalar_lea.hbm %s434_s1, 2048 }
   0x3   :  { %s26_s13 = sshll.u32 %s356_s12, 4  ;;  %p263_p0 = scmp.ne.s32.totalorder %s434_s1, %s262_s16  ;;  %s27_s13 = int_to_ptr.vmem [resolvable:$true] %s26_s13 }
   0x4   :  { %p266_p1 = scmp.lt.u32.totalorder %s262_s16, %s434_s1 }
   0x6   :  { %p268_p2 = pnand %p266_p1, %p263_p0 }
   0x8   :  { %271 = shalt.err (!%p268_p2)
}
   0x9   :  { %s272_s21 = scalar_lea.vmem %s27_s13, 2048  ;;  %p277_p4 = scmp.lt.s32.totalorder %s27_s13, %s27_s13 }
   0xa   :  { %p273_p3 = scmp.ne.s32.totalorder %s27_s13, %s272_s21  ;;  %p278_p5 = scmp.lt.s32.totalorder %s272_s21, %s272_s21 }
   0xc   :  { %p279_p6 = por %p278_p5, %p277_p4 }
   0xe   :  { %p280_p7 = pnand %p279_p6, %p273_p3 }
  0x10   :  { %283 = shalt.err (!%p280_p7)
}
  0x11   :  { %s357_s22 = smov 128   ;;  %s358_s23 = smov 8  }
  0x12   :  { %32 = dma.hbm_to_vmem [thread:$0]  %s434_s1, 2048, %s27_s13, [#allocation7], %s357_s22, %s357_s22, %s358_s23  }
  0x13   :  { %s359_s26 = smov [#allocation3]   ;;  %s360_s28 = smov [#allocation8]  }
  0x14   :  { %s17_s27 = sshll.u32 %s359_s26, 4  ;;  %s39_s29 = sshll.u32 %s360_s28, 4  ;;  %s18_s27 = int_to_ptr.vmem [resolvable:$true] %s17_s27  ;;  %s40_s29 = int_to_ptr.vmem [resolvable:$true] %s39_s29 }
  0x15   :  { %s284_s5 = scalar_lea.hbm %s433_s0, 128 }
  0x16   :  { %p285_p8 = scmp.ne.s32.totalorder %s433_s0, %s284_s5  ;;  %p288_p9 = scmp.lt.u32.totalorder %s284_s5, %s433_s0 }
  0x18   :  { %p290_p10 = pnand %p288_p9, %p285_p8 }
  0x1a   :  { %293 = shalt.err (!%p290_p10)
}
  0x1b   :  { %s294_s1 = scalar_lea.vmem %s18_s27, 128  ;;  %p299_p12 = scmp.lt.s32.totalorder %s18_s27, %s18_s27 }
  0x1c   :  { %p295_p11 = scmp.ne.s32.totalorder %s18_s27, %s294_s1  ;;  %p300_p13 = scmp.lt.s32.totalorder %s294_s1, %s294_s1 }
  0x1e   :  { %p301_p0 = por %p300_p13, %p299_p12 }
  0x20   :  { %p302_p1 = pnand %p301_p0, %p295_p11 }
  0x22   :  { %305 = shalt.err (!%p302_p1)
}
  0x23   :  { %20 = dma.hbm_to_vmem [thread:$0]  %s433_s0, 128, %s18_s27, [#allocation4]  }
  0x24   :  { %s306_s14 = scalar_lea.hbm %s435_s2, 16 }
  0x25   :  { %p307_p2 = scmp.ne.s32.totalorder %s435_s2, %s306_s14  ;;  %p310_p3 = scmp.lt.u32.totalorder %s306_s14, %s435_s2 }
  0x27   :  { %p312_p4 = pnand %p310_p3, %p307_p2 }
  0x29   :  { %315 = shalt.err (!%p312_p4)
}
  0x2a   :  { %s316_s19 = scalar_lea.vmem %s40_s29, 16  ;;  %s320_s20 = scalar_lea.vmem %s40_s29, 32 }
  0x2b   :  { %p317_p5 = scmp.ne.s32.totalorder %s40_s29, %s316_s19  ;;  %p321_p6 = scmp.lt.s32.totalorder %s40_s29, %s40_s29 }
  0x2c   :  { %p322_p7 = scmp.lt.s32.totalorder %s320_s20, %s316_s19 }
  0x2e   :  { %p323_p8 = por %p322_p7, %p321_p6 }
  0x30   :  { %p324_p9 = pnand %p323_p8, %p317_p5 }
  0x32   :  { %327 = shalt.err (!%p324_p9)
}
  0x33   :  { %42 = dma.hbm_to_vmem [thread:$0]  %s435_s2, 16, %s40_s29, [#allocation7]  }
  0x34   :  { %350 = dma.done.wait [#allocation4], 128  }
  0x35   :  { %351 = vsyncadd [#allocation4], 4294967168 }
  0x36   :  { %352 = dma.done.wait [#allocation7], 2064  }
  0x37   :  { %353 = vsyncadd [#allocation7], 4294965232  ;;  %v361_v0 = vmov 0.0|0.0   ;;  %vm362_vm0 = vmmov 0   ;;  %v363_v1 = vmov 0.0   ;;  %v59_v2 = vld [vmem:[#allocation6] sm:$0xff] }
  0x38   :  { %229 = vmatprep.subr.bf16.mxu0 %v361_v0  ;;  %226 = vmatprep.mubr.msk.f32.mxu0 %vm362_vm0, %v363_v1  ;;  %v60_v3 = vld [vmem:[#allocation6 + $0x8] sm:$0xff]  ;;  %v61_v4 = vld [vmem:[#allocation6 + $0x10] sm:$0xff]  ;;  %v62_v6 = vld [vmem:[#allocation6 + $0x18] sm:$0xff]  ;;  %s364_s2 = smov [#allocation9]  }
  0x39   :  { %v230_v5 = vpack.c.bf16 %v60_v3, %v59_v2  ;;  %v233_v7 = vpack.c.bf16 %v62_v6, %v61_v4  ;;  %v63_v8 = vld [vmem:[#allocation6 + $0x20] sm:$0xff]  ;;  %v64_v9 = vld [vmem:[#allocation6 + $0x28] sm:$0xff]  ;;  %v65_v11 = vld [vmem:[#allocation6 + $0x30] sm:$0xff]  ;;  %s166_s22 = sshll.u32 %s364_s2, 4  ;;  %s167_s22 = int_to_ptr.vmem [resolvable:$true] %s166_s22 }
  0x3a   :  { %v236_v10 = vpack.c.bf16 %v64_v9, %v63_v8  ;;  %v66_v12 = vld [vmem:[#allocation6 + $0x38] sm:$0xff]  ;;  %v67_v14 = vld [vmem:[#allocation6 + $0x40] sm:$0xff]  ;;  %v68_v15 = vld [vmem:[#allocation6 + $0x48] sm:$0xff]  ;;  %s328_s23 = scalar_lea.vmem %s167_s22, 128  ;;  %p333_p11 = scmp.lt.s32.totalorder %s167_s22, %s167_s22 }
  0x3b   :  { %231 = vmatpush3.bf16.msra.mxu0 %v230_v5  ;;  %v239_v13 = vpack.c.bf16 %v66_v12, %v65_v11  ;;  %v242_v16 = vpack.c.bf16 %v68_v15, %v67_v14  ;;  %v69_v17 = vld [vmem:[#allocation6 + $0x50] sm:$0xff]  ;;  %v70_v18 = vld [vmem:[#allocation6 + $0x58] sm:$0xff]  ;;  %v71_v20 = vld [vmem:[#allocation6 + $0x60] sm:$0xff]  ;;  %p329_p10 = scmp.ne.s32.totalorder %s167_s22, %s328_s23  ;;  %p334_p12 = scmp.lt.s32.totalorder %s328_s23, %s328_s23 }
  0x3c   :  { %232 = vmatprep.subr.bf16.mxu0 %v361_v0  ;;  %v245_v19 = vpack.c.bf16 %v70_v18, %v69_v17  ;;  %v72_v21 = vld [vmem:[#allocation6 + $0x68] sm:$0xff]  ;;  %v73_v23 = vld [vmem:[#allocation6 + $0x70] sm:$0xff]  ;;  %v74_v24 = vld [vmem:[#allocation6 + $0x78] sm:$0xff] }
  0x3d   :  { %v248_v22 = vpack.c.bf16 %v72_v21, %v71_v20  ;;  %v251_v25 = vpack.c.bf16 %v74_v24, %v73_v23  ;;  %v58_v26 = vld [vmem:[#allocation3] sm:$0xff]  ;;  %v176_v27 = vld [vmem:[#allocation8] ss:$0 sm:$0xff]  ;;  %p335_p13 = por %p334_p12, %p333_p11 }
  0x3f   :  { %234 = vmatpush3.bf16.msra.mxu0 %v233_v7  ;;  %p336_p0 = pnand %p335_p13, %p329_p10 }
  0x40   :  { %235 = vmatprep.subr.bf16.mxu0 %v361_v0 }
  0x43   :  { %237 = vmatpush3.bf16.msra.mxu0 %v236_v10 }
  0x44   :  { %238 = vmatprep.subr.bf16.mxu0 %v361_v0 }
  0x47   :  { %240 = vmatpush3.bf16.msra.mxu0 %v239_v13 }
  0x48   :  { %241 = vmatprep.subr.bf16.mxu0 %v361_v0 }
  0x4b   :  { %243 = vmatpush3.bf16.msra.mxu0 %v242_v16 }
  0x4c   :  { %244 = vmatprep.subr.bf16.mxu0 %v361_v0 }
  0x4f   :  { %246 = vmatpush3.bf16.msra.mxu0 %v245_v19 }
  0x50   :  { %247 = vmatprep.subr.bf16.mxu0 %v361_v0 }
  0x53   :  { %249 = vmatpush3.bf16.msra.mxu0 %v248_v22 }
  0x54   :  { %250 = vmatprep.subr.bf16.mxu0 %v361_v0 }
  0x57   :  { %252 = vmatpush3.bf16.msra.mxu0 %v251_v25 }
  0x5a   :  { %227 = vmatmul.mubr.f32.vlgmr.msra.gmra.mrb[0].mxu0 %v58_v26 }
 0x12d   :  { %v141_v28 = vpop.f32.mrb[0].mxu0 }
 0x12e   :  { %v158_v29 = vadd.f32 %v176_v27, %v141_v28  ;;  %v228_v30 = vpop.f32.mrb[1].mxu0 }
 0x130   :  { %159 = vst [vmem:[#allocation9] sm:$0xff] %v158_v29 }
 0x131   :  { %339 = shalt.err (!%p336_p0)
}
 0x132   :  { %s340_s26 = scalar_lea.hbm %s436_s3, 128 }
 0x133   :  { %p341_p1 = scmp.ne.s32.totalorder %s436_s3, %s340_s26  ;;  %p344_p2 = scmp.lt.u32.totalorder %s340_s26, %s436_s3 }
 0x135   :  { %p346_p3 = pnand %p344_p2, %p341_p1 }
 0x137   :  { %349 = shalt.err (!%p346_p3)
}
 0x138   :  { %169 = dma.vmem_to_hbm [thread:$0]  %s167_s22, 128, %s436_s3, [#allocation5]  }
 0x139   :  { %354 = dma.done.wait [#allocation5], 128  }
 0x13a   :  { %355 = vsyncadd [#allocation5], 4294967168 }
 0x13b   :  { %173 = vsyncpa [#allocation4], 1 }
 0x13c   :  { %174 = vsyncpa [#allocation7], 1 }
 0x13d   :  { %175 = vsyncpa [#allocation5], 1 }

</bundles_post_ra>
